<compile_context>
chip_gen: v7x
topology: tpu7x:2x2x1
jax: 0.10.0
libtpu: 0.0.40
codegen_flags: <defaults>
</compile_context>

<pallas_src>
import math
import jax
import jax.numpy as jnp
from jax.experimental import pallas as pl
from jax.experimental.pallas import tpu as pltpu


def _round_up(x, m):
    return ((x + m - 1) // m) * m


def _tpu_config():
    """(physical VMEM bytes, # TensorCores per device, default token tile)."""
    kind = ""
    try:
        kind = jax.devices()[0].device_kind.lower()
    except Exception:
        pass
    if "v7" in kind:
        return 64 * 1024 * 1024, 2, 256
    if "v6" in kind:
        return 128 * 1024 * 1024, 1, 512
    if "v4" in kind or "v5p" in kind:
        return 128 * 1024 * 1024, 2, 256
    # v5e / unknown: conservative single-core, 128 MiB.
    return 128 * 1024 * 1024, 1, 256


def _tile_h_candidates(hidden_p):
    """Multiples of 128 that evenly divide hidden_p, descending."""
    m = hidden_p // 128
    return sorted({d * 128 for d in range(1, m + 1) if m % d == 0}, reverse=True)


def _vmem_footprint(tile_t, tile_h, d_model_p, x_bytes, w_bytes, out_bytes, use_acc):
    """Rough per-step VMEM bytes (double-buffered blocks + scratch)."""
    f = 2 * tile_t * d_model_p * x_bytes          # x block
    f += 2 * d_model_p * tile_h * w_bytes         # W1 block
    f += 2 * tile_h * d_model_p * w_bytes         # W2 block
    f += 2 * tile_t * d_model_p * out_bytes       # output block
    f += 2 * 8 * tile_h * 4 + 2 * 8 * d_model_p * 4   # biases (sublane-padded)
    if use_acc:
        f += tile_t * d_model_p * 4               # f32 accumulator scratch
    f += tile_t * tile_h * 4                      # intermediate GELU activations
    return f


def _gelu_exact_f32(h):
    # Exact (erf-based) GELU in f32, matching PyTorch nn.GELU() default.
    return 0.5 * h * (1.0 + jax.lax.erf(h * (1.0 / math.sqrt(2.0))))


def _expert_kernel_acc(x_ref, w1_ref, b1_ref, w2_ref, b2_ref, o_ref, acc_ref):
    """One (token-tile, hidden-tile) step, f32 scratch accumulator (non-f32 out)."""
    k = pl.program_id(1)

    @pl.when(k == 0)
    def _():
        acc_ref[...] = jnp.zeros_like(acc_ref)

    h = jnp.dot(x_ref[...], w1_ref[...], preferred_element_type=jnp.float32)
    h = _gelu_exact_f32(h + b1_ref[...].astype(jnp.float32))
    acc_ref[...] += jnp.dot(
        h.astype(w2_ref.dtype), w2_ref[...], preferred_element_type=jnp.float32
    )

    @pl.when(k == pl.num_programs(1) - 1)
    def _():
        o_ref[...] = (acc_ref[...] + b2_ref[...].astype(jnp.float32)).astype(o_ref.dtype)


def _expert_kernel_f32out(x_ref, w1_ref, b1_ref, w2_ref, b2_ref, o_ref):
    """Same, but accumulates directly into the grid-resident f32 output block."""
    k = pl.program_id(1)

    @pl.when(k == 0)
    def _():
        o_ref[...] = jnp.zeros_like(o_ref)

    h = jnp.dot(x_ref[...], w1_ref[...], preferred_element_type=jnp.float32)
    h = _gelu_exact_f32(h + b1_ref[...].astype(jnp.float32))
    o_ref[...] += jnp.dot(
        h.astype(w2_ref.dtype), w2_ref[...], preferred_element_type=jnp.float32
    )

    @pl.when(k == pl.num_programs(1) - 1)
    def _():
        o_ref[...] += b2_ref[...].astype(jnp.float32)


def pad_expert_params(w1, b1, w2, b2, dtype=None):
    """Pad (and optionally cast) weights ONCE, outside the per-call path."""
    d_model, hidden = w1.shape
    d_model_p = _round_up(d_model, 128)
    hidden_p = _round_up(hidden, 128)
    if dtype is not None:
        w1, b1, w2, b2 = (a.astype(dtype) for a in (w1, b1, w2, b2))
    w1 = jnp.pad(w1, ((0, d_model_p - d_model), (0, hidden_p - hidden)))
    b1 = jnp.pad(b1, (0, hidden_p - hidden))
    w2 = jnp.pad(w2, ((0, hidden_p - hidden), (0, d_model_p - d_model)))
    b2 = jnp.pad(b2, (0, d_model_p - d_model))
    return w1, b1, w2, b2


def expert_forward(x, w1, b1, w2, b2, *, tile_t=None, tile_h=None):
    """x: [..., d_model] -> [..., d_model] via the fused Pallas kernel.

    w1/b1/w2/b2 may be passed raw ([d_model, 4*d_model], ...) or pre-padded to
    128-multiples via pad_expert_params (preferred: avoids per-call padding).
    """
    orig_shape = x.shape
    d_model = orig_shape[-1]
    d_model_p = _round_up(d_model, 128)

    in_dim, hid_dim = w1.shape
    assert in_dim in (d_model, d_model_p), "w1 first dim must be d_model (or padded)"
    assert w2.shape == (hid_dim, in_dim)
    assert b1.shape == (hid_dim,)
    assert b2.shape == (in_dim,)
    hidden_p = _round_up(hid_dim, 128)

    x2d = x.reshape(-1, d_model)
    n_tok = x2d.shape[0]
    out_dtype = x.dtype

    vmem_phys, num_tc, default_tile_t = _tpu_config()
    vmem_limit = int(vmem_phys * 0.75)          # ~96 MiB on v5e/v6e, ~48 MiB on v7x
    budget = int(vmem_limit * 0.85)             # headroom for compiler internals

    # Sublane packing multiple depends on activation dtype (f32:8, bf16:16, int8:32).
    itemsize = jnp.dtype(x.dtype).itemsize
    sub = {1: 32, 2: 16, 4: 8}.get(itemsize, 8)

    # --- Token tile: big (weight reuse), clamped to the token count, and on
    #     2-TensorCore chips capped so the parallel axis has >= 2 tiles. ---
    tile_t = default_tile_t if tile_t is None else tile_t
    n_tok_sub = _round_up(n_tok, sub)
    tile_t = max(sub, min(_round_up(tile_t, sub), n_tok_sub))
    if num_tc > 1 and n_tok_sub >= 2 * sub:
        half = _round_up(-(-n_tok_sub // 2), sub)
        tile_t = min(tile_t, half)

    # --- Hidden tile: largest 128-multiple divisor of hidden_p under target,
    #     auto-shrunk (then tile_t) until the per-step VMEM footprint fits. ---
    target_h = _round_up(1024 if tile_h is None else tile_h, 128)
    cands = _tile_h_candidates(hidden_p)
    tile_h = next(c for c in cands if c <= target_h)

    use_acc = out_dtype != jnp.float32
    w_bytes = jnp.dtype(w1.dtype).itemsize
    out_bytes = jnp.dtype(out_dtype).itemsize
    while True:
        fp = _vmem_footprint(tile_t, tile_h, d_model_p, itemsize, w_bytes, out_bytes, use_acc)
        if fp <= budget:
            break
        idx = cands.index(tile_h)
        if idx + 1 < len(cands):
            tile_h = cands[idx + 1]
        elif tile_t > sub:
            tile_t = max(sub, _round_up(tile_t // 2, sub))
        else:
            break

    n_tok_p = _round_up(n_tok_sub, tile_t)
    grid_t = n_tok_p // tile_t
    grid_h = hidden_p // tile_h

    # --- Pad activations per call; pad weights only if not pre-padded. ---
    if (n_tok_p - n_tok) or (d_model_p - d_model):
        x2d = jnp.pad(x2d, ((0, n_tok_p - n_tok), (0, d_model_p - d_model)))
    if (in_dim, hid_dim) != (d_model_p, hidden_p):
        w1 = jnp.pad(w1, ((0, d_model_p - in_dim), (0, hidden_p - hid_dim)))
        w2 = jnp.pad(w2, ((0, hidden_p - hid_dim), (0, d_model_p - in_dim)))
        b1 = jnp.pad(b1, (0, hidden_p - hid_dim))
        b2 = jnp.pad(b2, (0, d_model_p - in_dim))
    b1 = b1.reshape(1, hidden_p)
    b2 = b2.reshape(1, d_model_p)

    cost = pl.CostEstimate(
        flops=4 * n_tok_p * d_model_p * hidden_p,
        transcendentals=n_tok_p * hidden_p,
        bytes_accessed=(
            n_tok_p * d_model_p * (itemsize + out_bytes)
            + grid_t * 2 * d_model_p * hidden_p * w_bytes
        ),
    )

    kernel = _expert_kernel_acc if use_acc else _expert_kernel_f32out
    scratch = [pltpu.VMEM((tile_t, d_model_p), jnp.float32)] if use_acc else []

    out = pl.pallas_call(
        kernel,
        out_shape=jax.ShapeDtypeStruct((n_tok_p, d_model_p), out_dtype),
        grid_spec=pltpu.PrefetchScalarGridSpec(
            num_scalar_prefetch=0,
            grid=(grid_t, grid_h),
            in_specs=[
                # Token tile of activations (revisited across the hidden axis).
                pl.BlockSpec((tile_t, d_model_p), lambda i, k: (i, 0)),
                # W1 hidden-tile: (d_model, tile_h).
                pl.BlockSpec((d_model_p, tile_h), lambda i, k: (0, k)),
                # b1 hidden-tile.
                pl.BlockSpec((1, tile_h), lambda i, k: (0, k)),
                # W2 hidden-tile: (tile_h, d_model).
                pl.BlockSpec((tile_h, d_model_p), lambda i, k: (k, 0)),
                # b2: full, constant across the grid.
                pl.BlockSpec((1, d_model_p), lambda i, k: (0, 0)),
            ],
            out_specs=pl.BlockSpec((tile_t, d_model_p), lambda i, k: (i, 0)),
            scratch_shapes=scratch,
        ),
        compiler_params=pltpu.CompilerParams(
            # Token axis shards across TensorCores; hidden axis carries the
            # accumulator and must stay sequential.
            dimension_semantics=("parallel", "arbitrary"),
            vmem_limit_bytes=vmem_limit,
        ),
        cost_estimate=cost,
        # TODO(synk): blocks constant in k (x, b2, output) could use
        # pipeline_mode=pl.Buffered(1) to drop their redundant double-buffer
        # once that knob is stable everywhere (frees a few MiB on v7x).
    )(x2d, w1, b1, w2, b2)

    return out[:n_tok, :d_model].reshape(orig_shape)


def init_expert_params(key, d_model):
    """Deterministic init matching nn.Linear's shapes (uniform +/- 1/sqrt(fan_in))."""
    hidden = 4 * d_model
    k1, k2, k3, k4 = jax.random.split(key, 4)
    bound1 = 1.0 / math.sqrt(d_model)
    bound2 = 1.0 / math.sqrt(hidden)
    w1 = jax.random.uniform(k1, (d_model, hidden), jnp.float32, -bound1, bound1)
    b1 = jax.random.uniform(k2, (hidden,), jnp.float32, -bound1, bound1)
    w2 = jax.random.uniform(k3, (hidden, d_model), jnp.float32, -bound2, bound2)
    b2 = jax.random.uniform(k4, (d_model,), jnp.float32, -bound2, bound2)
    return w1, b1, w2, b2


def expert_reference(x, w1, b1, w2, b2):
    h = x @ w1 + b1
    h = jax.nn.gelu(h, approximate=False)
    return h @ w2 + b2


if __name__ == "__main__":
    key = jax.random.PRNGKey(0)
    k_x, k_p = jax.random.split(key)

    batch, seq, d_model = 2, 8, 32
    x = jax.random.normal(k_x, (batch, seq, d_model), dtype=jnp.float32)
    w1, b1, w2, b2 = init_expert_params(k_p, d_model)

    # Hoist the weight padding out of the per-call path (done once here).
    w1_p, b1_p, w2_p, b2_p = pad_expert_params(w1, b1, w2, b2)

    out = expert_forward(x, w1_p, b1_p, w2_p, b2_p)
    out = jax.block_until_ready(out)

    ref = expert_reference(x, w1, b1, w2, b2)
    assert out.shape == x.shape
    assert jnp.allclose(out, ref, atol=1e-4, rtol=1e-4), "mismatch vs reference"

    print("KERNEL_OK")
</pallas_src>

<mosaic_0001>
module attributes {stable_mosaic.version = 11 : i64} {
  func.func @_expert_kernel_f32out(%arg0: i32, %arg1: i32, %arg2: memref<16x128xf32, #tpu.memory_space<vmem>>, %arg3: memref<128x128xf32, #tpu.memory_space<vmem>>, %arg4: memref<1x128xf32, #tpu.memory_space<vmem>>, %arg5: memref<128x128xf32, #tpu.memory_space<vmem>>, %arg6: memref<1x128xf32, #tpu.memory_space<vmem>>, %arg7: memref<16x128xf32, #tpu.memory_space<vmem>>) attributes {dimension_semantics = [#tpu.dimension_semantics<parallel>, #tpu.dimension_semantics<arbitrary>], iteration_bounds = array<i64: 1, 1>, scalar_prefetch = 0 : i64, scratch_operands = 0 : i64, tpu.core_type = #tpu.core_type<tc>, window_params = [{transform_indices = @transform_0, window_bounds = array<i64: 16, 128>}, {transform_indices = @transform_1, window_bounds = array<i64: 128, 128>}, {transform_indices = @transform_2, window_bounds = array<i64: 1, 128>}, {transform_indices = @transform_3, window_bounds = array<i64: 128, 128>}, {pipeline_mode = #tpu.pipeline_mode<synchronous>, transform_indices = @transform_4, window_bounds = array<i64: 1, 128>}, {transform_indices = @transform_5, window_bounds = array<i64: 16, 128>}]} {
    %c0_i32 = arith.constant 0 : i32
    %0 = arith.cmpi eq, %arg1, %c0_i32 : i32
    %1 = arith.extui %0 : i1 to i32
    %c0_i32_0 = arith.constant 0 : i32
    %2 = arith.cmpi ne, %1, %c0_i32_0 : i32
    scf.if %2 {
      %cst_18 = arith.constant 0.000000e+00 : f32
      %25 = vector.broadcast %cst_18 : f32 to vector<16x128xf32>
      %c0_19 = arith.constant 0 : index
      %c0_20 = arith.constant 0 : index
      %26 = vector.load %arg7[%c0_19, %c0_20] : memref<16x128xf32, #tpu.memory_space<vmem>>, vector<16x128xf32>
      tpu.vector_store %arg7[%c0_19, %c0_20], %25 {strides = array<i32>} : memref<16x128xf32, #tpu.memory_space<vmem>>, vector<16x128xf32>,
    } else {
    }
    %c0 = arith.constant 0 : index
    %c0_1 = arith.constant 0 : index
    %3 = vector.load %arg2[%c0, %c0_1] : memref<16x128xf32, #tpu.memory_space<vmem>>, vector<16x128xf32>
    %c0_2 = arith.constant 0 : index
    %c0_3 = arith.constant 0 : index
    %4 = vector.load %arg3[%c0_2, %c0_3] : memref<128x128xf32, #tpu.memory_space<vmem>>, vector<128x128xf32>
    %cst = arith.constant dense<0.000000e+00> : vector<16x128xf32>
    %5 = tpu.matmul %3, %4, %cst {dimension_numbers = #tpu.dot_dimension_numbers<[1], [0], [0], [1], [0, 0, 1, 1], [], []>} : vector<16x128xf32>, vector<128x128xf32>, vector<16x128xf32> -> vector<16x128xf32>
    %c0_4 = arith.constant 0 : index
    %c0_5 = arith.constant 0 : index
    %6 = vector.load %arg4[%c0_4, %c0_5] : memref<1x128xf32, #tpu.memory_space<vmem>>, vector<1x128xf32>
    %7 = vector.broadcast %6 : vector<1x128xf32> to vector<16x128xf32>
    %8 = arith.addf %5, %7 : vector<16x128xf32>
    %cst_6 = arith.constant 5.000000e-01 : f32
    %9 = vector.broadcast %cst_6 : f32 to vector<16x128xf32>
    %10 = arith.mulf %9, %8 : vector<16x128xf32>
    %cst_7 = arith.constant 0.707106769 : f32
    %11 = vector.broadcast %cst_7 : f32 to vector<16x128xf32>
    %12 = arith.mulf %8, %11 : vector<16x128xf32>
    %13 = math.erf %12 : vector<16x128xf32>
    %cst_8 = arith.constant 1.000000e+00 : f32
    %14 = vector.broadcast %cst_8 : f32 to vector<16x128xf32>
    %15 = arith.addf %14, %13 : vector<16x128xf32>
    %16 = arith.mulf %10, %15 : vector<16x128xf32>
    %c0_9 = arith.constant 0 : index
    %c0_10 = arith.constant 0 : index
    %17 = vector.load %arg7[%c0_9, %c0_10] : memref<16x128xf32, #tpu.memory_space<vmem>>, vector<16x128xf32>
    %c0_11 = arith.constant 0 : index
    %c0_12 = arith.constant 0 : index
    %18 = vector.load %arg5[%c0_11, %c0_12] : memref<128x128xf32, #tpu.memory_space<vmem>>, vector<128x128xf32>
    %cst_13 = arith.constant dense<0.000000e+00> : vector<16x128xf32>
    %19 = tpu.matmul %16, %18, %cst_13 {dimension_numbers = #tpu.dot_dimension_numbers<[1], [0], [0], [1], [0, 0, 1, 1], [], []>} : vector<16x128xf32>, vector<128x128xf32>, vector<16x128xf32> -> vector<16x128xf32>
    %20 = arith.addf %17, %19 : vector<16x128xf32>
    %c0_14 = arith.constant 0 : index
    %c0_15 = arith.constant 0 : index
    %21 = vector.load %arg7[%c0_14, %c0_15] : memref<16x128xf32, #tpu.memory_space<vmem>>, vector<16x128xf32>
    tpu.vector_store %arg7[%c0_14, %c0_15], %20 {strides = array<i32>} : memref<16x128xf32, #tpu.memory_space<vmem>>, vector<16x128xf32>,
    %c0_i32_16 = arith.constant 0 : i32
    %22 = arith.cmpi eq, %arg1, %c0_i32_16 : i32
    %23 = arith.extui %22 : i1 to i32
    %c0_i32_17 = arith.constant 0 : i32
    %24 = arith.cmpi ne, %23, %c0_i32_17 : i32
    scf.if %24 {
      %c0_18 = arith.constant 0 : index
      %c0_19 = arith.constant 0 : index
      %25 = vector.load %arg7[%c0_18, %c0_19] : memref<16x128xf32, #tpu.memory_space<vmem>>, vector<16x128xf32>
      %c0_20 = arith.constant 0 : index
      %c0_21 = arith.constant 0 : index
      %26 = vector.load %arg6[%c0_20, %c0_21] : memref<1x128xf32, #tpu.memory_space<vmem>>, vector<1x128xf32>
      %27 = vector.broadcast %26 : vector<1x128xf32> to vector<16x128xf32>
      %28 = arith.addf %25, %27 : vector<16x128xf32>
      %c0_22 = arith.constant 0 : index
      %c0_23 = arith.constant 0 : index
      %29 = vector.load %arg7[%c0_22, %c0_23] : memref<16x128xf32, #tpu.memory_space<vmem>>, vector<16x128xf32>
      tpu.vector_store %arg7[%c0_22, %c0_23], %28 {strides = array<i32>} : memref<16x128xf32, #tpu.memory_space<vmem>>, vector<16x128xf32>,
    } else {
    }
    return
  }
  func.func @transform_0(%arg0: i32, %arg1: i32) -> (i32, i32) {
    %c0_i32 = arith.constant 0 : i32
    %c0_i32_0 = arith.constant 0 : i32
    return %arg0, %c0_i32 : i32, i32
  }
  func.func @transform_1(%arg0: i32, %arg1: i32) -> (i32, i32) {
    %c0_i32 = arith.constant 0 : i32
    %c0_i32_0 = arith.constant 0 : i32
    return %c0_i32, %arg1 : i32, i32
  }
  func.func @transform_2(%arg0: i32, %arg1: i32) -> (i32, i32) {
    %c0_i32 = arith.constant 0 : i32
    %c0_i32_0 = arith.constant 0 : i32
    return %c0_i32, %arg1 : i32, i32
  }
  func.func @transform_3(%arg0: i32, %arg1: i32) -> (i32, i32) {
    %c0_i32 = arith.constant 0 : i32
    %c0_i32_0 = arith.constant 0 : i32
    return %arg1, %c0_i32 : i32, i32
  }
  func.func @transform_4(%arg0: i32, %arg1: i32) -> (i32, i32) {
    %c0_i32 = arith.constant 0 : i32
    %c0_i32_0 = arith.constant 0 : i32
    %c0_i32_1 = arith.constant 0 : i32
    return %c0_i32, %c0_i32_0 : i32, i32
  }
  func.func @transform_5(%arg0: i32, %arg1: i32) -> (i32, i32) {
    %c0_i32 = arith.constant 0 : i32
    %c0_i32_0 = arith.constant 0 : i32
    return %arg0, %c0_i32 : i32, i32
  }
}

</mosaic_0001>

<bundles_post_ra>
// kernel: tpu_custom_call.1
= control target key start
LH: loop header
LB: loop body
LE: loop exit
PB: predicated region body
PF: predicated region fallthrough
CT: control target
= control target key end

     0   :  { %10 = vsyncpa [#allocation3], 0  ;;  %s787_s0 = inlined_call_operand.hbm [shape: f32[16,128], index: 0, kind: input, shape index: {}]   ;;  %s788_s1 = inlined_call_operand.hbm [shape: f32[128,128], index: 1, kind: input, shape index: {}]   ;;  %s789_s2 = inlined_call_operand.hbm [shape: f32[1,128], index: 2, kind: input, shape index: {}]   ;;  %s790_s3 = inlined_call_operand.hbm [shape: f32[128,128], index: 3, kind: input, shape index: {}]   ;;  %s791_s4 = inlined_call_operand.hbm [shape: f32[1,128], index: 4, kind: input, shape index: {}]   ;;  %s792_s5 = inlined_call_operand.hbm [shape: f32[16,128], index: 5, kind: output, shape index: {}]  }
   0x1   :  { %11 = vsyncpa [#allocation6], 0 }
   0x2   :  { %12 = vsyncpa [#allocation9], 0 }
   0x3   :  { %13 = vsyncpa [#allocation4], 0  ;;  %s658_s18 = smov [#allocation5]   ;;  %s659_s20 = smov [#allocation8]  }
   0x4   :  { %s31_s19 = sshll.u32 %s658_s18, 4  ;;  %s53_s21 = sshll.u32 %s659_s20, 4  ;;  %s32_s19 = int_to_ptr.vmem [resolvable:$true] %s31_s19  ;;  %s696_s21 = int_to_ptr.vmem [resolvable:$true] %s53_s21 }
   0x5   :  { %s518_s24 = scalar_lea.hbm %s788_s1, 2048 }
   0x6   :  { %p519_p0 = scmp.ne.s32.totalorder %s788_s1, %s518_s24  ;;  %p522_p1 = scmp.lt.u32.totalorder %s518_s24, %s788_s1 }
   0x8   :  { %p524_p2 = pnand %p522_p1, %p519_p0 }
   0xa   :  { %527 = shalt.err (!%p524_p2)
}
   0xb   :  { %s528_s29 = scalar_lea.vmem %s32_s19, 2048  ;;  %p533_p4 = scmp.lt.s32.totalorder %s32_s19, %s32_s19 }
   0xc   :  { %p529_p3 = scmp.ne.s32.totalorder %s32_s19, %s528_s29  ;;  %p534_p5 = scmp.lt.s32.totalorder %s528_s29, %s528_s29 }
   0xe   :  { %p535_p6 = por %p534_p5, %p533_p4 }
  0x10   :  { %p536_p7 = pnand %p535_p6, %p529_p3 }
  0x12   :  { %539 = shalt.err (!%p536_p7)
}
  0x13   :  { %s660_s30 = smov 128   ;;  %s661_s6 = smov 8  }
  0x14   :  { %37 = dma.hbm_to_vmem [thread:$0]  %s788_s1, 2048, %s32_s19, [#allocation6], %s660_s30, %s660_s30, %s661_s6  }
  0x15   :  { %s540_s11 = scalar_lea.hbm %s790_s3, 2048 }
  0x16   :  { %p541_p8 = scmp.ne.s32.totalorder %s790_s3, %s540_s11  ;;  %p544_p9 = scmp.lt.u32.totalorder %s540_s11, %s790_s3 }
  0x18   :  { %p546_p10 = pnand %p544_p9, %p541_p8 }
  0x1a   :  { %549 = shalt.err (!%p546_p10)
}
  0x1b   :  { %s550_s16 = scalar_lea.vmem %s696_s21, 2048  ;;  %p555_p12 = scmp.lt.s32.totalorder %s696_s21, %s696_s21 }
  0x1c   :  { %p551_p11 = scmp.ne.s32.totalorder %s696_s21, %s550_s16  ;;  %p556_p13 = scmp.lt.s32.totalorder %s550_s16, %s550_s16 }
  0x1e   :  { %p557_p0 = por %p556_p13, %p555_p12 }
  0x20   :  { %p558_p1 = pnand %p557_p0, %p551_p11 }
  0x22   :  { %561 = shalt.err (!%p558_p1)
}
  0x23   :  { %59 = dma.hbm_to_vmem [thread:$0]  %s790_s3, 2048, %s696_s21, [#allocation9], %s660_s30, %s660_s30, %s661_s6  }
  0x24   :  { %s662_s18 = smov [#allocation2]   ;;  %s663_s20 = smov [#allocation7]  }
  0x25   :  { %s19_s19 = sshll.u32 %s662_s18, 4  ;;  %s44_s22 = sshll.u32 %s663_s20, 4  ;;  %s20_s19 = int_to_ptr.vmem [resolvable:$true] %s19_s19  ;;  %s45_s22 = int_to_ptr.vmem [resolvable:$true] %s44_s22 }
  0x26   :  { %s562_s25 = scalar_lea.hbm %s787_s0, 256 }
  0x27   :  { %p563_p2 = scmp.ne.s32.totalorder %s787_s0, %s562_s25  ;;  %p566_p3 = scmp.lt.u32.totalorder %s562_s25, %s787_s0 }
  0x29   :  { %p568_p4 = pnand %p566_p3, %p563_p2 }
  0x2b   :  { %571 = shalt.err (!%p568_p4)
}
  0x2c   :  { %s572_s3 = scalar_lea.vmem %s20_s19, 256  ;;  %p577_p6 = scmp.lt.s32.totalorder %s20_s19, %s20_s19 }
  0x2d   :  { %p573_p5 = scmp.ne.s32.totalorder %s20_s19, %s572_s3  ;;  %p578_p7 = scmp.lt.s32.totalorder %s572_s3, %s572_s3 }
  0x2f   :  { %p579_p8 = por %p578_p7, %p577_p6 }
  0x31   :  { %p580_p9 = pnand %p579_p8, %p573_p5 }
  0x33   :  { %583 = shalt.err (!%p580_p9)
}
  0x34   :  { %25 = dma.hbm_to_vmem [thread:$0]  %s787_s0, 256, %s20_s19, [#allocation3], %s660_s30, %s660_s30, %s661_s6  }
  0x35   :  { %s584_s10 = scalar_lea.hbm %s789_s2, 16 }
  0x36   :  { %p585_p10 = scmp.ne.s32.totalorder %s789_s2, %s584_s10  ;;  %p588_p11 = scmp.lt.u32.totalorder %s584_s10, %s789_s2 }
  0x38   :  { %p590_p12 = pnand %p588_p11, %p585_p10 }
  0x3a   :  { %593 = shalt.err (!%p590_p12)
}
  0x3b   :  { %s594_s15 = scalar_lea.vmem %s45_s22, 16  ;;  %s598_s16 = scalar_lea.vmem %s45_s22, 32 }
  0x3c   :  { %p595_p13 = scmp.ne.s32.totalorder %s45_s22, %s594_s15  ;;  %p599_p0 = scmp.lt.s32.totalorder %s45_s22, %s45_s22 }
  0x3d   :  { %p600_p1 = scmp.lt.s32.totalorder %s598_s16, %s594_s15 }
  0x3f   :  { %p601_p2 = por %p600_p1, %p599_p0 }
  0x41   :  { %p602_p3 = pnand %p601_p2, %p595_p13 }
  0x43   :  { %605 = shalt.err (!%p602_p3)
}
  0x44   :  { %47 = dma.hbm_to_vmem [thread:$0]  %s789_s2, 16, %s45_s22, [#allocation6]  }
  0x45   :  { %s664_s17 = smov [#allocation10]   ;;  %s606_s23 = scalar_lea.hbm %s791_s4, 16 }
  0x46   :  { %s66_s18 = sshll.u32 %s664_s17, 4  ;;  %p607_p4 = scmp.ne.s32.totalorder %s791_s4, %s606_s23  ;;  %s67_s18 = int_to_ptr.vmem [resolvable:$true] %s66_s18 }
  0x47   :  { %p610_p5 = scmp.lt.u32.totalorder %s606_s23, %s791_s4 }
  0x49   :  { %p612_p6 = pnand %p610_p5, %p607_p4 }
  0x4b   :  { %615 = shalt.err (!%p612_p6)
}
  0x4c   :  { %s616_s28 = scalar_lea.vmem %s67_s18, 16  ;;  %s620_s2 = scalar_lea.vmem %s67_s18, 32 }
  0x4d   :  { %p617_p7 = scmp.ne.s32.totalorder %s67_s18, %s616_s28  ;;  %p621_p8 = scmp.lt.s32.totalorder %s67_s18, %s67_s18 }
  0x4e   :  { %p622_p9 = scmp.lt.s32.totalorder %s620_s2, %s616_s28 }
  0x50   :  { %p623_p10 = por %p622_p9, %p621_p8 }
  0x52   :  { %p624_p11 = pnand %p623_p10, %p617_p7 }
  0x54   :  { %627 = shalt.err (!%p624_p11)
}
  0x55   :  { %69 = dma.hbm_to_vmem [thread:$0]  %s791_s4, 16, %s67_s18, [#allocation9]  }
  0x56   :  { %650 = dma.done.wait [#allocation3], 256  }
  0x57   :  { %651 = vsyncadd [#allocation3], 4294967040 }
  0x58   :  { %652 = dma.done.wait [#allocation6], 2064  }
  0x59   :  { %653 = vsyncadd [#allocation6], 4294965232 }
  0x5a   :  { %654 = dma.done.wait [#allocation9], 2064  }
  0x5b   :  { %655 = vsyncadd [#allocation9], 4294965232  ;;  %v93_v0 = vld [vmem:[#allocation5] sm:$0xff]  ;;  %v94_v1 = vld [vmem:[#allocation5 + $0x8] sm:$0xff]  ;;  %s665_s4 = smov [#allocation11]  }
  0x5c   :  { %v95_v2 = vld [vmem:[#allocation5 + $0x10] sm:$0xff]  ;;  %v441_v3 = vpack.c.bf16 %v94_v1, %v93_v0  ;;  %v96_v4 = vld [vmem:[#allocation5 + $0x18] sm:$0xff]  ;;  %v97_v6 = vld [vmem:[#allocation5 + $0x20] sm:$0xff]  ;;  %s319_s3 = sshll.u32 %s665_s4, 4  ;;  %s320_s3 = int_to_ptr.vmem [resolvable:$true] %s319_s3 }
  0x5d   :  { %v445_v5 = vpack.c.bf16 %v96_v4, %v95_v2  ;;  %v98_v7 = vld [vmem:[#allocation5 + $0x28] sm:$0xff]  ;;  %v99_v9 = vld [vmem:[#allocation5 + $0x30] sm:$0xff]  ;;  %v100_v10 = vld [vmem:[#allocation5 + $0x38] sm:$0xff]  ;;  %s628_s21 = scalar_lea.vmem %s320_s3, 256  ;;  %p633_p13 = scmp.lt.s32.totalorder %s320_s3, %s320_s3 }
  0x5e   :  { %442 = vmatprep.subr.bf16.mxu0 %v441_v3  ;;  %v449_v8 = vpack.c.bf16 %v98_v7, %v97_v6  ;;  %v91_v11 = vld [vmem:[#allocation2] sm:$0xff]  ;;  %v203_v12 = vld [vmem:[#allocation8] sm:$0xff]  ;;  %v206_v16 = vld [vmem:[#allocation8 + $0x18] sm:$0xff]  ;;  %v453_v20 = vpack.c.bf16 %v100_v10, %v99_v9  ;;  %p629_p12 = scmp.ne.s32.totalorder %s320_s3, %s628_s21  ;;  %p634_p0 = scmp.lt.s32.totalorder %s628_s21, %s628_s21 }
  0x5f   :  { %444 = vmatpush3.bf16.msra.mxu0 %v441_v3  ;;  %403 = vmatprep.mubr.f32.mxu0 %v91_v11  ;;  %v204_v13 = vld [vmem:[#allocation8 + $0x8] sm:$0xff]  ;;  %v205_v14 = vld [vmem:[#allocation8 + $0x10] sm:$0xff]  ;;  %v207_v18 = vld [vmem:[#allocation8 + $0x20] sm:$0xff] }
  0x60   :  { %446 = vmatprep.subr.bf16.mxu0 %v445_v5  ;;  %v473_v15 = vpack.c.bf16 %v204_v13, %v203_v12  ;;  %v477_v17 = vpack.c.bf16 %v206_v16, %v205_v14  ;;  %v208_v19 = vld [vmem:[#allocation8 + $0x28] sm:$0xff]  ;;  %v101_v21 = vld [vmem:[#allocation5 + $0x40] sm:$0xff]  ;;  %v104_v26 = vld [vmem:[#allocation5 + $0x58] sm:$0xff]  ;;  %p635_p1 = por %p634_p0, %p633_p13 }
  0x61   :  { %v102_v22 = vld [vmem:[#allocation5 + $0x48] sm:$0xff]  ;;  %v481_v23 = vpack.c.bf16 %v208_v19, %v207_v18  ;;  %v103_v25 = vld [vmem:[#allocation5 + $0x50] sm:$0xff]  ;;  %v105_v28 = vld [vmem:[#allocation5 + $0x60] sm:$0xff] }
  0x62   :  { %474 = vmatprep.subr.bf16.mxu1 %v473_v15  ;;  %v457_v24 = vpack.c.bf16 %v102_v22, %v101_v21  ;;  %v461_v27 = vpack.c.bf16 %v104_v26, %v103_v25  ;;  %v106_v29 = vld [vmem:[#allocation5 + $0x68] sm:$0xff]  ;;  %v107_v31 = vld [vmem:[#allocation5 + $0x70] sm:$0xff]  ;;  %v108_v32 = vld [vmem:[#allocation5 + $0x78] sm:$0xff]  ;;  %p636_p2 = pnand %p635_p1, %p629_p12 }
  0x63   :  { %448 = vmatpush3.bf16.msra.mxu0 %v445_v5  ;;  %476 = vmatpush3.bf16.msra.mxu1 %v473_v15  ;;  %v465_v30 = vpack.c.bf16 %v106_v29, %v105_v28  ;;  %v469_v33 = vpack.c.bf16 %v108_v32, %v107_v31  ;;  %v92_v34 = vld [vmem:[#allocation2 + $0x8] sm:$0xff]  ;;  %v211_v38 = vld [vmem:[#allocation8 + $0x40] sm:$0xff]  ;;  %v212_v39 = vld [vmem:[#allocation8 + $0x48] sm:$0xff] }
  0x64   :  { %450 = vmatprep.subr.bf16.mxu0 %v449_v8  ;;  %478 = vmatprep.subr.bf16.mxu1 %v477_v17  ;;  %v209_v35 = vld [vmem:[#allocation8 + $0x30] sm:$0xff]  ;;  %v210_v36 = vld [vmem:[#allocation8 + $0x38] sm:$0xff]  ;;  %v489_v40 = vpack.c.bf16 %v212_v39, %v211_v38  ;;  %v215_v44 = vld [vmem:[#allocation8 + $0x60] sm:$0xff] }
  0x65   :  { %v485_v37 = vpack.c.bf16 %v210_v36, %v209_v35  ;;  %v213_v41 = vld [vmem:[#allocation8 + $0x50] sm:$0xff]  ;;  %v214_v42 = vld [vmem:[#allocation8 + $0x58] sm:$0xff]  ;;  %v216_v45 = vld [vmem:[#allocation8 + $0x68] sm:$0xff] }
  0x66   :  { %v493_v43 = vpack.c.bf16 %v214_v42, %v213_v41  ;;  %v497_v46 = vpack.c.bf16 %v216_v45, %v215_v44  ;;  %v217_v47 = vld [vmem:[#allocation8 + $0x70] sm:$0xff]  ;;  %v218_v48 = vld [vmem:[#allocation8 + $0x78] sm:$0xff]  ;;  %v334_v2 = vld [vmem:[#allocation10] ss:$0 sm:$0xff] }
  0x67   :  { %452 = vmatpush3.bf16.msra.mxu0 %v449_v8  ;;  %480 = vmatpush3.bf16.msra.mxu1 %v477_v17  ;;  %v501_v49 = vpack.c.bf16 %v218_v48, %v217_v47  ;;  %v333_v50 = vld [vmem:[#allocation7] ss:$0 sm:$0xff] }
  0x68   :  { %454 = vmatprep.subr.bf16.mxu0 %v453_v20  ;;  %482 = vmatprep.subr.bf16.mxu1 %v481_v23 }
  0x6b   :  { %456 = vmatpush3.bf16.msra.mxu0 %v453_v20  ;;  %484 = vmatpush3.bf16.msra.mxu1 %v481_v23 }
  0x6c   :  { %458 = vmatprep.subr.bf16.mxu0 %v457_v24  ;;  %486 = vmatprep.subr.bf16.mxu1 %v485_v37 }
  0x6f   :  { %460 = vmatpush3.bf16.msra.mxu0 %v457_v24  ;;  %488 = vmatpush3.bf16.msra.mxu1 %v485_v37 }
  0x70   :  { %462 = vmatprep.subr.bf16.mxu0 %v461_v27  ;;  %490 = vmatprep.subr.bf16.mxu1 %v489_v40 }
  0x73   :  { %464 = vmatpush3.bf16.msra.mxu0 %v461_v27  ;;  %492 = vmatpush3.bf16.msra.mxu1 %v489_v40 }
  0x74   :  { %466 = vmatprep.subr.bf16.mxu0 %v465_v30  ;;  %494 = vmatprep.subr.bf16.mxu1 %v493_v43 }
  0x77   :  { %468 = vmatpush3.bf16.msra.mxu0 %v465_v30  ;;  %496 = vmatpush3.bf16.msra.mxu1 %v493_v43 }
  0x78   :  { %470 = vmatprep.subr.bf16.mxu0 %v469_v33  ;;  %498 = vmatprep.subr.bf16.mxu1 %v497_v46 }
  0x7b   :  { %472 = vmatpush3.bf16.msra.mxu0 %v469_v33  ;;  %500 = vmatpush3.bf16.msra.mxu1 %v497_v46 }
  0x7c   :  { %502 = vmatprep.subr.bf16.mxu1 %v501_v49 }
  0x7e   :  { %404 = vmatmul.mubr.f32.vlgmr.msra.gmra.mrb[0].mxu0 %v92_v34 }
  0x7f   :  { %504 = vmatpush3.bf16.msra.mxu1 %v501_v49 }
 0x151   :  { %v405_v51 = vpop.f32.mrb[0].mxu0 }
 0x152   :  { %v188_v52 = vadd.f32 %v405_v51, %v333_v50  ;;  %v182_v53 = vpop.f32.mrb[1].mxu0 }
 0x153   :  { %v183_v54 = vadd.f32 %v333_v50, %v182_v53 }
 0x154   :  { %v194_v55 = vmul.f32 0.70710677, %v188_v52  ;;  %v192_v62 = vmul.f32 0.5, %v188_v52 }
 0x155   :  { %v193_v56 = vmul.f32 0.70710677, %v183_v54  ;;  %v191_v60 = vmul.f32 0.5, %v183_v54 }
 0x156   :  { %514 = verf.f32 %v194_v55 }
 0x157   :  { %516 = verf.f32 %v193_v56 }
 0x160   :  { %v515_v57 = vpop.eup %514 }
 0x161   :  { %v517_v58 = vpop.eup %516  ;;  %v198_v59 = vadd.f32 1.0, %v515_v57 }
 0x162   :  { %v197_v61 = vadd.f32 1.0, %v517_v58 }
 0x163   :  { %v200_v0 = vmul.f32 %v198_v59, %v192_v62 }
 0x164   :  { %v199_v63 = vmul.f32 %v197_v61, %v191_v60 }
 0x166   :  { %438 = vmatprep.mubr.f32.mxu1 %v199_v63 }
 0x167   :  { %439 = vmatmul.mubr.f32.vlgmr.msra.gmra.mrb[0].mxu1 %v200_v0 }
 0x23a   :  { %v440_v1 = vpop.f32.mrb[0].mxu1 }
 0x23b   :  { %v285_v3 = vpop.f32.mrb[1].mxu1  ;;  %v311_v4 = vadd.f32 %v440_v1, %v334_v2 }
 0x23c   :  { %v310_v5 = vadd.f32 %v334_v2, %v285_v3 }
 0x23d   :  { %313 = vst [vmem:[#allocation11 + $0x8] sm:$0xff] %v311_v4 }
 0x23e   :  { %312 = vst [vmem:[#allocation11] sm:$0xff] %v310_v5 }
 0x23f   :  { %639 = shalt.err (!%p636_p2)
}
 0x240   :  { %s640_s9 = scalar_lea.hbm %s792_s5, 256 }
 0x241   :  { %p641_p3 = scmp.ne.s32.totalorder %s792_s5, %s640_s9  ;;  %p644_p4 = scmp.lt.u32.totalorder %s640_s9, %s792_s5 }
 0x243   :  { %p646_p5 = pnand %p644_p4, %p641_p3 }
 0x245   :  { %649 = shalt.err (!%p646_p5)
}
 0x246   :  { %325 = dma.vmem_to_hbm [thread:$0]  %s320_s3, 256, %s792_s5, [#allocation4], %s660_s30, %s660_s30, %s661_s6  }
 0x247   :  { %656 = dma.done.wait [#allocation4], 256  }
 0x248   :  { %657 = vsyncadd [#allocation4], 4294967040 }
 0x249   :  { %329 = vsyncpa [#allocation3], 1 }
 0x24a   :  { %330 = vsyncpa [#allocation6], 1 }
 0x24b   :  { %331 = vsyncpa [#allocation9], 1 }
 0x24c   :  { %332 = vsyncpa [#allocation4], 1 }

</bundles_post_ra>
